<compile_context>
chip_gen: v6e
topology: v6e:2x2x1
jax: 0.10.0
libtpu: 0.0.40
codegen_flags: <defaults>
</compile_context>

<pallas_src>
import functools

import jax
import jax.numpy as jnp
import numpy as np
from jax.experimental import pallas as pl
from jax.experimental.pallas import tpu as pltpu


def _round_up(x: int, m: int) -> int:
    return ((x + m - 1) // m) * m


def _embed_dot_kernel(n_cust, idx_ref, tables_ref, wb_ref, out_ref):
    """One grid step == one batch tile of T rows.

    idx_ref    : (2, T)          int32 VMEM — row 0 = customer ids, row 1 = product ids.
    tables_ref : (F, n_total)    f32   VMEM — fused [cust; prod] table, pre-transposed,
                                              resident (single buffer, untiled operand).
    wb_ref     : (2,)            f32   SMEM — [w, b] of nn.Linear(1, 1).
    out_ref    : (1, T)          f32   VMEM — lane-dense output tile for this step.
    """
    tile_b = idx_ref.shape[1]
    n_total = tables_ref.shape[1]

    ids = idx_ref[...]                                   # (2, T) int32
    cid = ids[0:1, :]                                    # (1, T) rows into fused table
    pid = ids[1:2, :] + n_cust                           # (1, T) product rows (offset)
    # Target row per output column; concat at a lane boundary (T % 128 == 0) is free.
    cols = jnp.concatenate([cid, pid], axis=1)           # (1, 2T)

    # One-hot selector, batch along lanes: (n_total, 2T). OOB ids -> all-zero column.
    row_iota = jax.lax.broadcasted_iota(jnp.int32, (n_total, 2 * tile_b), 0)
    onehot = (row_iota == cols).astype(jnp.float32)      # (n_total, 2T)

    # Single fused gather matmul on the MXU: (F, K) @ (K, 2T) -> (F, 2T),
    # batch stays on lanes, contraction is the standard (M,K)x(K,N) orientation.
    gathered = jnp.dot(tables_ref[...], onehot,
                       preferred_element_type=jnp.float32)   # (F, 2T)
    custs = gathered[:, :tile_b]                              # (F, T)  free slice @ lane bdry
    prods = gathered[:, tile_b:]                              # (F, T)

    # torch.sum(custs * prods, dim=1, keepdim=True) -> (1, T) lane-dense
    dot = jnp.sum(custs * prods, axis=0, keepdims=True)

    # self.out(dot) ; self.sigmoid(...)   (scalars read once from SMEM)
    w = wb_ref[0]
    b = wb_ref[1]
    out_ref[...] = jax.nn.sigmoid(dot * w + b)                # full unmasked tile store


def pretrain_embedding_forward(x_idx, cust_table, prod_table, w, b, *, tile_b=None):
    """Forward pass of PreTrainEmbedding.

    x_idx      : (B, 2) int32  (col 0 = customer id, col 1 = product id)
    cust_table : (n_customers, n_factors) f32
    prod_table : (n_products,  n_factors) f32
    w, b       : nn.Linear(1, 1) parameters (any shape containing one scalar each)
    returns    : (B, 1) f32
    """
    B = x_idx.shape[0]
    n_cust, F = cust_table.shape
    n_prod, Fp = prod_table.shape
    assert F == Fp
    n_total = n_cust + n_prod

    # Adaptive batch tile: big enough to amortize per-step overhead, capped at 2048
    # so batches > 2048 still yield >= 2 grid steps for megacore "parallel" sharding.
    if tile_b is None:
        tile_b = min(_round_up(max(B, 1), 128), 2048)
    tile_b = _round_up(tile_b, 128)
    num_tiles = pl.cdiv(B, tile_b)
    b_pad = num_tiles * tile_b

    # Lane-dense indices (2, B_pad); padding uses id 0 (valid), padded outputs sliced off.
    idx_t = jnp.transpose(x_idx.astype(jnp.int32))            # (2, B)
    if b_pad != B:
        idx_t = jnp.pad(idx_t, ((0, 0), (0, b_pad - B)))

    # Fuse + pre-transpose the tables ONCE in the wrapper (grid-invariant):
    # (n_cust+n_prod, F) -> (F, n_total), so the kernel never re-transposes them.
    tables_t = jnp.transpose(jnp.concatenate(
        [cust_table.astype(jnp.float32), prod_table.astype(jnp.float32)], axis=0))

    # Linear(1,1) params packed into a single 1-D SMEM array.
    wb = jnp.stack([jnp.reshape(w, ()).astype(jnp.float32),
                    jnp.reshape(b, ()).astype(jnp.float32)])  # (2,)

    # Explicit VMEM budget: resident table (x1 buffer) + double-buffered idx/out tiles
    # + one-hot and gathered intermediates, with 2x slack + margin, capped with
    # headroom against this chip's per-core VMEM (v7x = 64 MiB/TC).
    est_bytes = (tables_t.size * 4
                 + 2 * (2 * tile_b * 4)            # idx tile, double buffered
                 + 2 * (1 * tile_b * 4)            # out tile, double buffered
                 + n_total * 2 * tile_b * 4        # one-hot intermediate
                 + F * 2 * tile_b * 4)             # gathered intermediate
    try:
        vmem_cap = int(pltpu.get_tpu_info().vmem_capacity_bytes)
    except Exception:
        vmem_cap = 64 << 20                        # conservative (v7x per-TC)
    vmem_limit = int(max(min(2 * est_bytes + (4 << 20), (vmem_cap * 3) // 4), 16 << 20))

    cost = pl.CostEstimate(
        flops=2 * (2 * b_pad) * n_total * F + 2 * b_pad * F,   # fused gather matmul + dot
        transcendentals=b_pad,                                 # sigmoid
        bytes_accessed=tables_t.size * 4 + b_pad * 2 * 4 + b_pad * 4,
    )

    out = pl.pallas_call(
        functools.partial(_embed_dot_kernel, n_cust),
        grid=(num_tiles,),
        in_specs=[
            # indices: one (2, T) lane-dense slab per tile (pipelined / double-buffered)
            pl.BlockSpec((2, tile_b), lambda i: (0, i)),
            # fused table: untiled, VMEM-resident for the whole kernel, single buffer
            pl.BlockSpec(memory_space=pltpu.MemorySpace.VMEM),
            # Linear(1,1) [w, b] scalars in SMEM
            pl.BlockSpec(memory_space=pltpu.MemorySpace.SMEM),
        ],
        out_specs=pl.BlockSpec((1, tile_b), lambda i: (0, i)),
        out_shape=jax.ShapeDtypeStruct((1, b_pad), jnp.float32),
        compiler_params=pltpu.CompilerParams(
            dimension_semantics=("parallel",),
            vmem_limit_bytes=vmem_limit),
        cost_estimate=cost,
    )(idx_t, tables_t, wb)

    # Free layout plumbing: lane-dense (1, B_pad) -> (B, 1)
    return out.reshape(b_pad, 1)[:B]


if __name__ == "__main__":
    # Small, deterministic synthetic setup (no checkpoint loading).
    n_customers, n_products, n_factors = 16, 16, 32
    batch = 8

    key = jax.random.PRNGKey(0)
    k_c, k_p, k_w, k_b, k_ci, k_pi = jax.random.split(key, 6)

    # nn.Embedding default init ~ N(0, 1); nn.Linear(1,1) init ~ U(-1, 1).
    cust_table = jax.random.normal(k_c, (n_customers, n_factors), jnp.float32)
    prod_table = jax.random.normal(k_p, (n_products, n_factors), jnp.float32)
    w = jax.random.uniform(k_w, (1, 1), jnp.float32, minval=-1.0, maxval=1.0)
    b = jax.random.uniform(k_b, (1, 1), jnp.float32, minval=-1.0, maxval=1.0)

    cust_ids = jax.random.randint(k_ci, (batch,), 0, n_customers, jnp.int32)
    prod_ids = jax.random.randint(k_pi, (batch,), 0, n_products, jnp.int32)
    x = jnp.stack([cust_ids, prod_ids], axis=1)               # (B, 2) int32

    out = pretrain_embedding_forward(x, cust_table, prod_table, w, b)
    out = jax.block_until_ready(out)

    # Pure-JAX reference of the PyTorch forward.
    custs = cust_table[x[:, 0]]
    prods = prod_table[x[:, 1]]
    dot = jnp.sum(custs * prods, axis=1, keepdims=True)
    ref = jax.nn.sigmoid(dot * w[0, 0] + b[0, 0])

    np.testing.assert_allclose(np.asarray(out), np.asarray(ref),
                               rtol=1e-5, atol=1e-5)
    assert out.shape == (batch, 1) and out.dtype == jnp.float32
    print("KERNEL_OK")
</pallas_src>

<mosaic_0001>
module attributes {stable_mosaic.version = 11 : i64} {
  func.func @_embed_dot_kernel(%arg0: i32, %arg1: memref<2x128xi32, #tpu.memory_space<vmem>>, %arg2: memref<32x32xf32, #tpu.memory_space<vmem>>, %arg3: memref<2xf32, #tpu.memory_space<smem>>, %arg4: memref<1x128xf32, #tpu.memory_space<vmem>>) attributes {dimension_semantics = [#tpu.dimension_semantics<parallel>], iteration_bounds = array<i64: 1>, scalar_prefetch = 0 : i64, scratch_operands = 0 : i64, tpu.core_type = #tpu.core_type<tc>, window_params = [{transform_indices = @transform_0, window_bounds = array<i64: 2, 128>}, {pipeline_mode = #tpu.pipeline_mode<synchronous>, transform_indices = @transform_1, window_bounds = array<i64: 32, 32>}, {transform_indices = @transform_2, window_bounds = array<i64: 2>}, {transform_indices = @transform_3, window_bounds = array<i64: 1, 128>}]} {
    %c0 = arith.constant 0 : index
    %c0_0 = arith.constant 0 : index
    %0 = vector.load %arg1[%c0, %c0_0] : memref<2x128xi32, #tpu.memory_space<vmem>>, vector<2x128xi32>
    %1 = vector.extract_strided_slice %0 {offsets = [0, 0], sizes = [1, 128], strides = [1, 1]} : vector<2x128xi32> to vector<1x128xi32>
    %2 = vector.extract_strided_slice %0 {offsets = [1, 0], sizes = [1, 128], strides = [1, 1]} : vector<2x128xi32> to vector<1x128xi32>
    %c16_i32 = arith.constant 16 : i32
    %3 = vector.broadcast %c16_i32 : i32 to vector<1x128xi32>
    %4 = arith.addi %2, %3 : vector<1x128xi32>
    %5 = tpu.concatenate %1, %4 in 1 : vector<1x128xi32>, vector<1x128xi32> -> vector<1x256xi32>
    %6 = tpu.iota {dimensions = array<i32: 0>} : vector<32x256xi32>
    %7 = vector.broadcast %5 : vector<1x256xi32> to vector<32x256xi32>
    %8 = arith.cmpi eq, %6, %7 : vector<32x256xi32>
    %9 = arith.extui %8 : vector<32x256xi1> to vector<32x256xi32>
    %10 = arith.sitofp %9 : vector<32x256xi32> to vector<32x256xf32>
    %c0_1 = arith.constant 0 : index
    %c0_2 = arith.constant 0 : index
    %11 = vector.load %arg2[%c0_1, %c0_2] : memref<32x32xf32, #tpu.memory_space<vmem>>, vector<32x32xf32>
    %cst = arith.constant dense<0.000000e+00> : vector<32x256xf32>
    %12 = tpu.matmul %11, %10, %cst {dimension_numbers = #tpu.dot_dimension_numbers<[1], [0], [0], [1], [0, 0, 1, 1], [], []>} : vector<32x32xf32>, vector<32x256xf32>, vector<32x256xf32> -> vector<32x256xf32>
    %13 = vector.extract_strided_slice %12 {offsets = [0, 0], sizes = [32, 128], strides = [1, 1]} : vector<32x256xf32> to vector<32x128xf32>
    %14 = vector.extract_strided_slice %12 {offsets = [0, 128], sizes = [32, 128], strides = [1, 1]} : vector<32x256xf32> to vector<32x128xf32>
    %15 = arith.mulf %13, %14 : vector<32x128xf32>
    %cst_3 = arith.constant dense<0.000000e+00> : vector<128xf32>
    %16 = vector.multi_reduction <add>, %15, %cst_3 [0] : vector<32x128xf32> to vector<128xf32>
    %17 = vector.shape_cast %16 : vector<128xf32> to vector<1x128xf32>
    %c0_4 = arith.constant 0 : index
    %18 = memref.load %arg3[%c0_4] : memref<2xf32, #tpu.memory_space<smem>>
    %c1 = arith.constant 1 : index
    %19 = memref.load %arg3[%c1] : memref<2xf32, #tpu.memory_space<smem>>
    %20 = vector.broadcast %18 : f32 to vector<1x128xf32>
    %21 = arith.mulf %17, %20 : vector<1x128xf32>
    %22 = vector.broadcast %19 : f32 to vector<1x128xf32>
    %23 = arith.addf %21, %22 : vector<1x128xf32>
    %24 = arith.negf %23 : vector<1x128xf32>
    %25 = math.exp %24 : vector<1x128xf32>
    %cst_5 = arith.constant 1.000000e+00 : f32
    %26 = vector.broadcast %cst_5 : f32 to vector<1x128xf32>
    %27 = arith.addf %26, %25 : vector<1x128xf32>
    %28 = arith.divf %26, %27 : vector<1x128xf32>
    %c0_6 = arith.constant 0 : index
    %c0_7 = arith.constant 0 : index
    %29 = vector.load %arg4[%c0_6, %c0_7] : memref<1x128xf32, #tpu.memory_space<vmem>>, vector<1x128xf32>
    tpu.vector_store %arg4[%c0_6, %c0_7], %28 {strides = array<i32>} : memref<1x128xf32, #tpu.memory_space<vmem>>, vector<1x128xf32>,
    return
  }
  func.func @transform_0(%arg0: i32) -> (i32, i32) {
    %c0_i32 = arith.constant 0 : i32
    %c0_i32_0 = arith.constant 0 : i32
    return %c0_i32, %arg0 : i32, i32
  }
  func.func @transform_1(%arg0: i32) -> (i32, i32) {
    %c0_i32 = arith.constant 0 : i32
    %c0_i32_0 = arith.constant 0 : i32
    %c0_i32_1 = arith.constant 0 : i32
    return %c0_i32, %c0_i32_0 : i32, i32
  }
  func.func @transform_2(%arg0: i32) -> i32 {
    %c0_i32 = arith.constant 0 : i32
    %c0_i32_0 = arith.constant 0 : i32
    return %c0_i32 : i32
  }
  func.func @transform_3(%arg0: i32) -> (i32, i32) {
    %c0_i32 = arith.constant 0 : i32
    %c0_i32_0 = arith.constant 0 : i32
    return %c0_i32, %arg0 : i32, i32
  }
}

</mosaic_0001>

<bundles_post_ra>
// kernel: tpu_custom_call.1
= control target key start
LH: loop header
LB: loop body
LE: loop exit
PB: predicated region body
PF: predicated region fallthrough
CT: control target
= control target key end

     0   :  { %8 = vsyncpa [#allocation3], 0  ;;  %s405_s0 = inlined_call_operand.hbm [shape: s32[2,128], index: 0, kind: input, shape index: {}]   ;;  %s406_s1 = inlined_call_operand.hbm [shape: f32[32,32], index: 1, kind: input, shape index: {}]   ;;  %s407_s2 = inlined_call_operand.vmem [shape: f32[2], index: 2, kind: input, shape index: {}]   ;;  %s408_s3 = inlined_call_operand.hbm [shape: f32[1,128], index: 3, kind: output, shape index: {}]  }
   0x1   :  { %9 = vsyncpa [#allocation7], 0 }
   0x2   :  { %10 = vsyncpa [#allocation5], 0 }
   0x3   :  { %11 = vsyncpa [#allocation4], 0  ;;  %s365_s12 = smov [#allocation2]   ;;  %s366_s14 = smov [#allocation6]  }
   0x4   :  { %s18_s13 = sshll.u32 %s365_s12, 4  ;;  %s27_s15 = sshll.u32 %s366_s14, 4  ;;  %s19_s13 = int_to_ptr.vmem [resolvable:$true] %s18_s13  ;;  %s28_s15 = int_to_ptr.vmem [resolvable:$true] %s27_s15 }
   0x5   :  { %s293_s16 = scalar_lea.vmem %s19_s13, 32  ;;  %p298_p1 = scmp.lt.s32.totalorder %s19_s13, %s19_s13 }
   0x6   :  { %p294_p0 = scmp.ne.s32.totalorder %s19_s13, %s293_s16  ;;  %p299_p2 = scmp.lt.s32.totalorder %s293_s16, %s293_s16 }
   0x8   :  { %p300_p3 = por %p299_p2, %p298_p1 }
   0xa   :  { %p301_p4 = pnand %p300_p3, %p294_p0 }
   0xc   :  { %304 = shalt.err (!%p301_p4)
}
   0xd   :  { %21 = dma.hbm_to_vmem [thread:$0]  %s405_s0, 32, %s19_s13, [#allocation3]  }
   0xe   :  { %s313_s19 = scalar_lea.vmem %s28_s15, 512  ;;  %p318_p6 = scmp.lt.s32.totalorder %s28_s15, %s28_s15 }
   0xf   :  { %p314_p5 = scmp.ne.s32.totalorder %s28_s15, %s313_s19  ;;  %p319_p7 = scmp.lt.s32.totalorder %s313_s19, %s313_s19 }
  0x11   :  { %p320_p8 = por %p319_p7, %p318_p6 }
  0x13   :  { %p321_p9 = pnand %p320_p8, %p314_p5 }
  0x15   :  { %324 = shalt.err (!%p321_p9)
}
  0x16   :  { %s367_s20 = smov 128   ;;  %s368_s21 = smov 8  }
  0x17   :  { %33 = dma.hbm_to_vmem [thread:$0]  %s406_s1, 512, %s28_s15, [#allocation7], %s367_s20, %s367_s20, %s368_s21  }
  0x18   :  { %s40_s26 = sshll.u32 %s407_s2, 4  ;;  %s41_s26 = int_to_ptr.vmem [resolvable:$true] %s40_s26 }
  0x19   :  { %s325_s27 = scalar_lea.vmem %s41_s26, 16  ;;  %p330_p11 = scmp.lt.s32.totalorder %s41_s26, %s41_s26 }
  0x1a   :  { %p326_p10 = scmp.ne.s32.totalorder %s41_s26, %s325_s27  ;;  %p331_p12 = scmp.lt.s32.totalorder %s325_s27, %s325_s27 }
  0x1c   :  { %p332_p13 = por %p331_p12, %p330_p11 }
  0x1e   :  { %p333_p0 = pnand %p332_p13, %p326_p10 }
  0x20   :  { %336 = shalt.err (!%p333_p0)
}
  0x21   :  { %s369_s0 = smov [#allocation8]  }
  0x22   :  { %43 = dma.vmem_to_smem %s41_s26, 16, %s369_s0, [#allocation5]  }
  0x23   :  { %357 = dma.done.wait [#allocation3], 32  }
  0x24   :  { %358 = vsyncadd [#allocation3], 4294967264 }
  0x25   :  { %359 = dma.done.wait [#allocation7], 512  }
  0x26   :  { %360 = vsyncadd [#allocation7], 4294966784 }
  0x27   :  { %361 = dma.done.wait [#allocation5], 16  }
  0x28   :  { %362 = vsyncadd [#allocation5], 4294967280 }
  0x29   :  { %53 = sfence }
  0x2a   :  { %v54_v0 = vld [vmem:[#allocation2] sm:$0x3]  ;;  %v57_v1 = vlaneseq  ;;  %v370_v3 = vmov 0.0   ;;  %v371_v12 = vmov 1.0   ;;  %v94_v13 = vld [vmem:[#allocation6] sm:$0xff]  ;;  %vm98_vm8 = vcmask 261120  }
  0x2b   :  { %v55_v2 = vadd.s32 16, %v54_v0  ;;  %175 = vmatprep.mubr.f32.mxu0 %v370_v3  ;;  %187 = vmatprep.mubr.f32.mxu1 %v370_v3  ;;  %v96_v14 = vld [vmem:[#allocation6 + $0x10] sm:$0xff]  ;;  %v95_v15 = vld [vmem:[#allocation6 + $0x8] sm:$0xff]  ;;  %v97_v16 = vld [vmem:[#allocation6 + $0x18] sm:$0xff]  ;;  %s213_s1 = sld [smem:[#allocation8]]  ;;  %s372_s28 = smov [#allocation9]  }
  0x2c   :  { %v58_v4 = vshrl.u32 %v57_v1, 7  ;;  %s263_s2 = sld [smem:[#allocation8 + $0x1]]  ;;  %s232_s29 = sshll.u32 %s372_s28, 4  ;;  %s233_s29 = int_to_ptr.vmem [resolvable:$true] %s232_s29 }
  0x2d   :  { %v56_v5 = vrot.slane %v55_v2, 1  ;;  %s337_s30 = scalar_lea.vmem %s233_s29, 16  ;;  %s341_s4 = scalar_lea.vmem %s233_s29, 32 }
  0x2e   :  { %v61_v6 = vadd.s32 24, %v58_v4  ;;  %v64_v7 = vsub.s32 0, %v58_v4  ;;  %v60_v8 = vadd.s32 16, %v58_v4  ;;  %v59_v11 = vadd.s32 8, %v58_v4  ;;  %p338_p1 = scmp.ne.s32.totalorder %s233_s29, %s337_s30  ;;  %p342_p2 = scmp.lt.s32.totalorder %s233_s29, %s233_s29 }
  0x2f   :  { %p343_p3 = scmp.lt.s32.totalorder %s341_s4, %s337_s30 }
  0x30   :  { %v69_v9 = vrot.slane %v56_v5, %v64_v7  ;;  %v65_v10 = vrot.slane %v54_v0, %v64_v7 }
  0x31   :  { %v215_v37 = vstv %s213_s1  ;;  %p344_p4 = por %p343_p3, %p342_p2 }
  0x32   :  { %vm77_vm0 = vcmp.eq.s32.totalorder %v61_v6, %v69_v9  ;;  %vm76_vm1 = vcmp.eq.s32.totalorder %v61_v6, %v65_v10  ;;  %vm75_vm2 = vcmp.eq.s32.totalorder %v60_v8, %v69_v9  ;;  %vm74_vm3 = vcmp.eq.s32.totalorder %v60_v8, %v65_v10 }
  0x33   :  { %251 = vmatprep.subr.msk.mxu0 %vm77_vm0, %v371_v12  ;;  %265 = vmatprep.subr.msk.mxu1 %vm77_vm0, %v371_v12  ;;  %vm73_vm4 = vcmp.eq.s32.totalorder %v59_v11, %v69_v9  ;;  %vm72_vm5 = vcmp.eq.s32.totalorder %v59_v11, %v65_v10  ;;  %vm71_vm6 = vcmp.eq.s32.totalorder %v58_v4, %v69_v9  ;;  %v217_v39 = vstv %s263_s2  ;;  %p345_p5 = pnand %p344_p4, %p338_p1 }
  0x34   :  { %252 = vmatpush1.msk.msra.mxu0 %vm76_vm1, %v371_v12  ;;  %269 = vmatpush1.msk.msra.mxu1 %vm76_vm1, %v371_v12  ;;  %vm70_vm7 = vcmp.eq.s32.totalorder %v58_v4, %v65_v10 }
  0x35   :  { %253 = vmatprep.subr.msk.mxu0 %vm75_vm2, %v371_v12  ;;  %266 = vmatprep.subr.msk.mxu1 %vm75_vm2, %v371_v12 }
  0x36   :  { %254 = vmatpush1.msk.msra.mxu0 %vm74_vm3, %v371_v12  ;;  %270 = vmatpush1.msk.msra.mxu1 %vm74_vm3, %v371_v12 }
  0x37   :  { %255 = vmatprep.subr.msk.mxu0 %vm73_vm4, %v371_v12  ;;  %267 = vmatprep.subr.msk.mxu1 %vm73_vm4, %v371_v12 }
  0x38   :  { %256 = vmatpush1.msk.msra.mxu0 %vm72_vm5, %v371_v12  ;;  %271 = vmatpush1.msk.msra.mxu1 %vm72_vm5, %v371_v12 }
  0x39   :  { %257 = vmatprep.subr.msk.mxu0 %vm71_vm6, %v371_v12  ;;  %268 = vmatprep.subr.msk.mxu1 %vm71_vm6, %v371_v12 }
  0x3a   :  { %258 = vmatpush1.msk.msra.mxu0 %vm70_vm7, %v371_v12  ;;  %272 = vmatpush1.msk.msra.mxu1 %vm70_vm7, %v371_v12 }
  0x3b   :  { %259 = vmatmul.mubr.msk.f32.vlgmr.msra.gmra.mxu0 %vm98_vm8, %v94_v13  ;;  %261 = vmatmul.mubr.msk.f32.vlgmr.msra.gmra.mxu1 %vm98_vm8, %v96_v14 }
  0x3c   :  { %181 = vmatprep.mubr.f32.mxu0 %v370_v3  ;;  %193 = vmatprep.mubr.f32.mxu1 %v370_v3 }
  0x3f   :  { %260 = vmatmul.mubr.msk.f32.gmra.mxu0 %vm98_vm8, %v95_v15  ;;  %262 = vmatmul.mubr.msk.f32.gmra.mxu1 %vm98_vm8, %v97_v16 }
  0xfb   :  { %v177_v17 = vpop.f32.mrf.mxu0  ;;  %v189_v18 = vpop.f32.mrf.mxu1 }
  0xfd   :  { %v179_v19 = vpop.f32.mrf.mxu0  ;;  %v191_v20 = vpop.f32.mrf.mxu1 }
  0xfe   :  { %v200_v24 = vmul.f32 %v179_v19, %v177_v17  ;;  %v202_v27 = vmul.f32 %v191_v20, %v189_v18 }
  0xff   :  { %v183_v21 = vpop.f32.mrf.mxu0  ;;  %v195_v22 = vpop.f32.mrf.mxu1 }
 0x101   :  { %v185_v23 = vpop.f32.mrf.mxu0  ;;  %v197_v26 = vpop.f32.mrf.mxu1 }
 0x102   :  { %v201_v25 = vmul.f32 %v185_v23, %v183_v21  ;;  %v203_v29 = vmul.f32 %v197_v26, %v195_v22 }
 0x104   :  { %v204_v28 = vadd.f32 %v201_v25, %v200_v24 }
 0x106   :  { %v205_v30 = vadd.f32 %v204_v28, %v202_v27 }
 0x108   :  { %v206_v31 = vadd.f32 %v205_v30, %v203_v29 }
 0x10a   :  { %v207_v32 = vrot.slane %v206_v31, 4 }
 0x10c   :  { %v208_v33 = vadd.f32 %v207_v32, %v206_v31 }
 0x10e   :  { %v209_v34 = vrot.slane %v208_v33, 2 }
 0x110   :  { %v210_v35 = vadd.f32 %v209_v34, %v208_v33 }
 0x112   :  { %v211_v36 = vrot.slane %v210_v35, 1 }
 0x114   :  { %v212_v38 = vadd.f32 %v211_v36, %v210_v35 }
 0x116   :  { %v216_v40 = vmul.f32 %v215_v37, %v212_v38 }
 0x118   :  { %v218_v41 = vadd.f32 %v217_v39, %v216_v40 }
 0x11a   :  { %v264_v42 = vmul.f32 -1.442695, %v218_v41 }
 0x11c   :  { %281 = vpow2.f32 %v264_v42 }
 0x129   :  { %v282_v43 = vpop.eup %281 }
 0x12a   :  { %v222_v44 = vadd.f32 1.0, %v282_v43 }
 0x12c   :  { %283 = vrcp.f32 %v222_v44 }
 0x139   :  { %v284_v45 = vpop.eup %283 }
 0x13a   :  { %225 = vst [vmem:[#allocation9] sm:$0x1] %v284_v45 }
 0x13b   :  { %348 = shalt.err (!%p345_p5)
}
 0x13c   :  { %235 = dma.vmem_to_hbm [thread:$0]  %s233_s29, 16, %s408_s3, [#allocation4]  }
 0x13d   :  { %363 = dma.done.wait [#allocation4], 16  }
 0x13e   :  { %364 = vsyncadd [#allocation4], 4294967280 }
 0x13f   :  { %239 = vsyncpa [#allocation3], 1 }
 0x140   :  { %240 = vsyncpa [#allocation7], 1 }
 0x141   :  { %241 = vsyncpa [#allocation4], 1 }
 0x142   :  { %242 = vsyncpa [#allocation5], 1 }

</bundles_post_ra>
